<compile_context>
chip_gen: v7x
topology: tpu7x:2x2x1
jax: 0.10.0
libtpu: 0.0.40
codegen_flags: <defaults>
</compile_context>

<pallas_src>
import functools

import jax
import jax.numpy as jnp
from jax.experimental import pallas as pl
from jax.experimental.pallas import tpu as pltpu


def _round_up(x, m):
    return (x + m - 1) // m * m


# ----------------------------- Pallas kernels ------------------------------

def _mm_bias_act_kernel(a_ref, b_ref, bias_ref, o_ref, *, relu):
    # a: [TM, Kp] bf16, b: [Kp, TN] bf16, bias: [1, TN] f32 -> o: [TM, TN] bf16
    acc = jnp.dot(a_ref[...], b_ref[...], preferred_element_type=jnp.float32)
    acc = acc + bias_ref[...]
    if relu:
        acc = jnp.maximum(acc, 0.0)
    o_ref[...] = acc.astype(o_ref.dtype)


@functools.partial(jax.jit, static_argnames=("tm", "tn", "relu"))
def _matmul_padded(a_p, b_p, bias_p, *, tm, tn, relu):
    Mp, Kp = a_p.shape
    Np = b_p.shape[1]
    grid = (Mp // tm, Np // tn)
    return pl.pallas_call(
        functools.partial(_mm_bias_act_kernel, relu=relu),
        out_shape=jax.ShapeDtypeStruct((Mp, Np), jnp.bfloat16),
        grid_spec=pltpu.PrefetchScalarGridSpec(
            num_scalar_prefetch=0,
            grid=grid,
            in_specs=[
                pl.BlockSpec((tm, Kp), lambda i, j: (i, 0)),
                pl.BlockSpec((Kp, tn), lambda i, j: (0, j)),
                pl.BlockSpec((1, tn), lambda i, j: (0, j)),
            ],
            out_specs=pl.BlockSpec((tm, tn), lambda i, j: (i, j)),
        ),
        compiler_params=pltpu.CompilerParams(
            dimension_semantics=("parallel", "parallel"),
            vmem_limit_bytes=32 * 1024 * 1024),
    )(a_p, b_p, bias_p)


def matmul_bias_act(a, p, relu=False):
    """out = a @ W + b (+ReLU).  a:[M,K] (any float), W pre-padded bf16 [Kp,Np]."""
    M, K = a.shape
    Kp, Np = p["wm"].shape
    N = p["cout"]
    tm = 256 if M >= 256 else _round_up(M, 16)
    Mp = _round_up(M, tm)
    tn = 256 if Np % 256 == 0 else 128
    a_p = a.astype(jnp.bfloat16)
    if Mp != M or Kp != K:
        a_p = jnp.pad(a_p, ((0, Mp - M), (0, Kp - K)))
    out = _matmul_padded(a_p, p["wm"], p["b2"], tm=tm, tn=tn, relu=relu)
    return out[:M, :N]


def _dyn_kernel(x_ref, k_ref, o_ref):
    # x, k: [9, TL] bf16 (taps on sublanes, flattened M*C on lanes)
    prod = x_ref[...].astype(jnp.float32) * k_ref[...].astype(jnp.float32)
    o_ref[...] = jnp.sum(prod, axis=0, keepdims=True).astype(o_ref.dtype)


@functools.partial(jax.jit, static_argnames=("tl",))
def _dyn_reduce_padded(unf, ker, *, tl):
    Lp = unf.shape[1]
    grid = (Lp // tl,)
    return pl.pallas_call(
        _dyn_kernel,
        out_shape=jax.ShapeDtypeStruct((1, Lp), jnp.bfloat16),
        grid_spec=pltpu.PrefetchScalarGridSpec(
            num_scalar_prefetch=0,
            grid=grid,
            in_specs=[
                pl.BlockSpec((9, tl), lambda i: (0, i)),
                pl.BlockSpec((9, tl), lambda i: (0, i)),
            ],
            out_specs=pl.BlockSpec((1, tl), lambda i: (0, i)),
        ),
        compiler_params=pltpu.CompilerParams(
            dimension_semantics=("parallel",),
            vmem_limit_bytes=32 * 1024 * 1024),
    )(unf, ker)


def dyn_reduce(unf9, ker9):
    """unf9, ker9: [9, L] bf16 -> [L] bf16  (dynamic filtering tap-sum)."""
    L = unf9.shape[1]
    if L <= 8192:
        tl = _round_up(L, 128)
        Lp = tl
    else:
        tl = 8192
        Lp = _round_up(L, tl)
    if Lp != L:
        unf9 = jnp.pad(unf9, ((0, 0), (0, Lp - L)))
        ker9 = jnp.pad(ker9, ((0, 0), (0, Lp - L)))
    return _dyn_reduce_padded(unf9, ker9, tl=tl)[0, :L]


# ------------------------------ conv / glue --------------------------------

def conv2d(x, p, stride=1, padding=0, dilation=1, relu=False):
    """x:[N,H,W,Cin] NHWC, p: prepared conv params -> [N,Ho,Wo,Cout]."""
    N, H, W, Cin = x.shape
    KH, KW, Cout = p["kh"], p["kw"], p["cout"]
    Ho = (H + 2 * padding - dilation * (KH - 1) - 1) // stride + 1
    Wo = (W + 2 * padding - dilation * (KW - 1) - 1) // stride + 1
    if KH == 1 and KW == 1 and stride == 1 and padding == 0:
        a = x.reshape(N * H * W, Cin)                  # 1x1: no im2col copy
    else:
        xp = jnp.pad(x, ((0, 0), (padding, padding), (padding, padding), (0, 0)))
        cols = []
        for kh in range(KH):
            for kw in range(KW):
                hs, ws = kh * dilation, kw * dilation
                cols.append(xp[:, hs:hs + (Ho - 1) * stride + 1:stride,
                                  ws:ws + (Wo - 1) * stride + 1:stride, :])
        patches = jnp.stack(cols, axis=3)              # [N,Ho,Wo,KH*KW,Cin] bf16
        a = patches.reshape(N * Ho * Wo, KH * KW * Cin)
    out = matmul_bias_act(a, p, relu=relu)
    return out.reshape(N, Ho, Wo, Cout)


def pconv(x, p, padding=0, relu=False):                # plain nn.Conv2d
    return conv2d(x, p, padding=padding, relu=relu)


def basic_conv(x, p):                                  # BasicConv2d(3x3,p=1)+BN+ReLU
    return conv2d(x, p, padding=1, relu=True)


def maxpool2x2(x):
    N, H, W, C = x.shape
    return jnp.max(x.reshape(N, H // 2, 2, W // 2, 2, C), axis=(2, 4))


def upsample_add(x, y):
    # y + bilinear_resize(x -> y.spatial), align_corners=False (half-pixel).
    xu = jax.image.resize(x, (x.shape[0], y.shape[1], y.shape[2], x.shape[3]),
                          method="bilinear")
    return y + xu.astype(y.dtype)


# ------------------------------- parameters --------------------------------

class KeyGen:
    def __init__(self, key):
        self._key = key

    def __call__(self):
        self._key, sub = jax.random.split(self._key)
        return sub


def _prep_conv(w, b):
    """Pre-pad weights to bf16 [Kp,Np] and bias to f32 [1,Np] once, at init."""
    kh, kw, cin, cout = w.shape
    K = kh * kw * cin
    Kp, Np = _round_up(K, 128), _round_up(cout, 128)
    wm = jnp.pad(w.reshape(K, cout),
                 ((0, Kp - K), (0, Np - cout))).astype(jnp.bfloat16)
    b2 = jnp.pad(b.reshape(1, cout), ((0, 0), (0, Np - cout))).astype(jnp.float32)
    return {"wm": wm, "b2": b2, "kh": kh, "kw": kw, "cout": cout}


def make_conv(kg, kh, kw, cin, cout):
    std = (2.0 / (kh * kw * cin)) ** 0.5
    w = std * jax.random.normal(kg(), (kh, kw, cin, cout), jnp.float32)
    b = 0.01 * jax.random.normal(kg(), (cout,), jnp.float32)
    return _prep_conv(w, b)


def make_basic_conv(kg, kh, kw, cin, cout):
    # Conv(bias=False) + BatchNorm2d folded (inference: gamma=1,beta=0,mean=0,var=1)
    std = (2.0 / (kh * kw * cin)) ** 0.5
    w = std * jax.random.normal(kg(), (kh, kw, cin, cout), jnp.float32)
    w = w * (1.0 / (1.0 + 1e-5) ** 0.5)
    return _prep_conv(w, jnp.zeros((cout,), jnp.float32))


def make_dense_layer(kg, in_C, out_C, down_factor=4, k=4):
    mid = out_C // down_factor
    return {
        "down": make_conv(kg, 1, 1, in_C, mid),
        "blocks": [make_basic_conv(kg, 3, 3, mid * i, mid) for i in range(1, k + 1)],
        "fuse": make_basic_conv(kg, 3, 3, in_C + mid, out_C),
    }


def make_dense_trans(kg, in_C, out_C):
    return {
        "fuse_down_mul": make_basic_conv(kg, 3, 3, in_C, in_C),
        "res_main": make_dense_layer(kg, in_C, in_C, down_factor=in_C // out_C, k=4),
        "fuse_main": make_basic_conv(kg, 3, 3, in_C, out_C),
    }


def make_depth_dc(kg, in_xC, in_yC, out_C, down_factor=4):
    return {
        "fuse": make_conv(kg, 3, 3, in_xC, out_C),
        "gk0": make_conv(kg, 3, 3, in_yC, in_yC),
        "gk1": make_dense_layer(kg, in_yC, in_yC, down_factor=4, k=down_factor),
        "gk2": make_conv(kg, 1, 1, in_yC, in_xC * 9),
    }


def make_ddpm(kg, in_xC, in_yC, out_C, down_factor=4):
    mid = out_C // 4
    return {
        "down_input": make_conv(kg, 1, 1, in_xC, mid),
        "b1": make_depth_dc(kg, mid, in_yC, mid, down_factor),
        "b3": make_depth_dc(kg, mid, in_yC, mid, down_factor),
        "b5": make_depth_dc(kg, mid, in_yC, mid, down_factor),
        "fuse": make_basic_conv(kg, 3, 3, 4 * mid, out_C),
    }


def make_vgg(kg, in_ch):
    cfg = {
        "s1": [(in_ch, 64), (64, 64)],
        "s2": [(64, 128), (128, 128)],
        "s4": [(128, 256), (256, 256), (256, 256)],
        "s8": [(256, 512), (512, 512), (512, 512)],
        "s16": [(512, 512), (512, 512), (512, 512)],
    }
    return {k: [make_conv(kg, 3, 3, a, b) for a, b in v] for k, v in cfg.items()}


def make_params(kg):
    return {
        "rgb": make_vgg(kg, 3),
        "depth": make_vgg(kg, 1),
        "trans16": make_conv(kg, 1, 1, 512, 64),
        "trans8": make_conv(kg, 1, 1, 512, 64),
        "trans4": make_conv(kg, 1, 1, 256, 64),
        "trans2": make_conv(kg, 1, 1, 128, 64),
        "trans1": make_conv(kg, 1, 1, 64, 32),
        "depth_trans16": make_dense_trans(kg, 512, 64),
        "depth_trans8": make_dense_trans(kg, 512, 64),
        "depth_trans4": make_dense_trans(kg, 256, 64),
        "upconv16": make_basic_conv(kg, 3, 3, 64, 64),
        "upconv8": make_basic_conv(kg, 3, 3, 64, 64),
        "upconv4": make_basic_conv(kg, 3, 3, 64, 64),
        "upconv2": make_basic_conv(kg, 3, 3, 64, 32),
        "upconv1": make_basic_conv(kg, 3, 3, 32, 32),
        "selfdc_16": make_ddpm(kg, 64, 64, 64, 4),
        "selfdc_8": make_ddpm(kg, 64, 64, 64, 4),
        "selfdc_4": make_ddpm(kg, 64, 64, 64, 4),
        "classifier": make_conv(kg, 1, 1, 32, 1),
    }


# ------------------------------- sub-modules --------------------------------

def vgg_stage(x, convs, pool):
    if pool:
        x = maxpool2x2(x)
    for p in convs:
        x = conv2d(x, p, padding=1, relu=True)
    return x


def dense_layer(x, p):
    down = pconv(x, p["down"])                          # 1x1
    outs = []
    feats = None
    for blk in p["blocks"]:
        inp = jnp.concatenate(outs + [down], axis=-1)
        feats = basic_conv(inp, blk)
        outs.append(feats)
    return basic_conv(jnp.concatenate([x, feats], axis=-1), p["fuse"])


def dense_trans(rgb, depth, p):
    feat = basic_conv(rgb + depth, p["fuse_down_mul"])
    return basic_conv(dense_layer(feat, p["res_main"]) + feat, p["fuse_main"])


def depth_dc3x3(x, y, p, dilation):
    N, H, W, xC = x.shape
    k = pconv(y, p["gk0"], padding=1)                   # 3x3, no relu
    k = dense_layer(k, p["gk1"])
    k = pconv(k, p["gk2"])                              # 1x1 -> xC*9
    ker = k.reshape(N, H, W, xC, 9)                     # channel split (c, kpos)
    ker9 = jnp.moveaxis(ker, -1, 0).reshape(9, -1)      # [9, N*H*W*xC]
    d = dilation
    xp_ = jnp.pad(x, ((0, 0), (d, d), (d, d), (0, 0)))
    cols = [xp_[:, kh * d:kh * d + H, kw * d:kw * d + W, :]
            for kh in range(3) for kw in range(3)]
    unf9 = jnp.stack(cols, axis=0).reshape(9, -1)       # [9, N*H*W*xC]
    res = dyn_reduce(unf9.astype(jnp.bfloat16), ker9.astype(jnp.bfloat16))
    res = res.reshape(N, H, W, xC)
    return pconv(res, p["fuse"], padding=1)


def ddpm(x, y, p):
    x = pconv(x, p["down_input"])                       # 1x1 -> 16
    r1 = depth_dc3x3(x, y, p["b1"], 1)
    r3 = depth_dc3x3(x, y, p["b3"], 3)
    r5 = depth_dc3x3(x, y, p["b5"], 5)
    return basic_conv(jnp.concatenate([x, r1, r3, r5], axis=-1), p["fuse"])


# -------------------------------- forward -----------------------------------

def hdfnet_forward(params, in_data, in_depth):
    x = jnp.transpose(in_data, (0, 2, 3, 1)).astype(jnp.bfloat16)   # NCHW -> NHWC
    d = jnp.transpose(in_depth, (0, 2, 3, 1)).astype(jnp.bfloat16)
    rgb, dep = params["rgb"], params["depth"]

    in1 = vgg_stage(x, rgb["s1"], False)
    in1_d = vgg_stage(d, dep["s1"], False)
    in2 = vgg_stage(in1, rgb["s2"], True)
    in2_d = vgg_stage(in1_d, dep["s2"], True)
    in4 = vgg_stage(in2, rgb["s4"], True)
    in4_d = vgg_stage(in2_d, dep["s4"], True)
    in8 = vgg_stage(in4, rgb["s8"], True)
    in8_d = vgg_stage(in4_d, dep["s8"], True)
    in16 = vgg_stage(in8, rgb["s16"], True)
    in16_d = vgg_stage(in8_d, dep["s16"], True)

    aux4 = dense_trans(in4, in4_d, params["depth_trans4"])
    aux8 = dense_trans(in8, in8_d, params["depth_trans8"])
    aux16 = dense_trans(in16, in16_d, params["depth_trans16"])

    t1 = pconv(in1, params["trans1"])
    t2 = pconv(in2, params["trans2"])
    t4 = pconv(in4, params["trans4"])
    t8 = pconv(in8, params["trans8"])
    t16 = pconv(in16, params["trans16"])

    out16 = basic_conv(t16, params["upconv16"])
    out8 = upsample_add(ddpm(out16, aux16, params["selfdc_16"]), t8)
    out8 = basic_conv(out8, params["upconv8"])
    out4 = upsample_add(ddpm(out8, aux8, params["selfdc_8"]), t4)
    out4 = basic_conv(out4, params["upconv4"])
    out2 = upsample_add(ddpm(out4, aux4, params["selfdc_4"]), t2)
    out2 = basic_conv(out2, params["upconv2"])
    out1 = upsample_add(out2, t1)
    out1 = basic_conv(out1, params["upconv1"])
    out = pconv(out1, params["classifier"])             # 1x1 -> 1 channel
    out = jax.nn.sigmoid(out.astype(jnp.float32))
    return jnp.transpose(out, (0, 3, 1, 2))             # back to NCHW, f32


# ---------------------------------- main -------------------------------------

if __name__ == "__main__":
    root = jax.random.PRNGKey(0)
    k_params, k_rgb, k_dep = jax.random.split(root, 3)

    params = make_params(KeyGen(k_params))

    # Small shapes: batch=1, spatial 32x32 (must be divisible by 16).
    N, H, W = 1, 32, 32
    in_data = jax.random.normal(k_rgb, (N, 3, H, W), jnp.float32)
    in_depth = jax.random.normal(k_dep, (N, 1, H, W), jnp.float32)

    out = hdfnet_forward(params, in_data, in_depth)
    out = jax.block_until_ready(out)

    assert out.shape == (N, 1, H, W), out.shape
    assert bool(jnp.all(jnp.isfinite(out)))
    assert bool(jnp.all((out >= 0.0) & (out <= 1.0)))
    print("KERNEL_OK")
</pallas_src>

<mosaic_0001>
module attributes {stable_mosaic.version = 11 : i64} {
  func.func @_mm_bias_act_kernel(%arg0: i32, %arg1: i32, %arg2: memref<256x128xbf16, #tpu.memory_space<vmem>>, %arg3: memref<128x128xbf16, #tpu.memory_space<vmem>>, %arg4: memref<1x128xf32, #tpu.memory_space<vmem>>, %arg5: memref<256x128xbf16, #tpu.memory_space<vmem>>) attributes {dimension_semantics = [#tpu.dimension_semantics<parallel>, #tpu.dimension_semantics<parallel>], iteration_bounds = array<i64: 4, 1>, scalar_prefetch = 0 : i64, scratch_operands = 0 : i64, tpu.core_type = #tpu.core_type<tc>, window_params = [{transform_indices = @transform_0, window_bounds = array<i64: 256, 128>}, {transform_indices = @transform_1, window_bounds = array<i64: 128, 128>}, {transform_indices = @transform_2, window_bounds = array<i64: 1, 128>}, {transform_indices = @transform_3, window_bounds = array<i64: 256, 128>}]} {
    %c0 = arith.constant 0 : index
    %c0_0 = arith.constant 0 : index
    %0 = vector.load %arg2[%c0, %c0_0] : memref<256x128xbf16, #tpu.memory_space<vmem>>, vector<256x128xbf16>
    %c0_1 = arith.constant 0 : index
    %c0_2 = arith.constant 0 : index
    %1 = vector.load %arg3[%c0_1, %c0_2] : memref<128x128xbf16, #tpu.memory_space<vmem>>, vector<128x128xbf16>
    %cst = arith.constant dense<0.000000e+00> : vector<256x128xf32>
    %2 = tpu.matmul %0, %1, %cst {dimension_numbers = #tpu.dot_dimension_numbers<[1], [0], [0], [1], [0, 0, 1, 1], [], []>} : vector<256x128xbf16>, vector<128x128xbf16>, vector<256x128xf32> -> vector<256x128xf32>
    %c0_3 = arith.constant 0 : index
    %c0_4 = arith.constant 0 : index
    %3 = vector.load %arg4[%c0_3, %c0_4] : memref<1x128xf32, #tpu.memory_space<vmem>>, vector<1x128xf32>
    %4 = vector.broadcast %3 : vector<1x128xf32> to vector<256x128xf32>
    %5 = arith.addf %2, %4 : vector<256x128xf32>
    %cst_5 = arith.constant 0.000000e+00 : f32
    %6 = vector.broadcast %cst_5 : f32 to vector<256x128xf32>
    %7 = arith.maximumf %5, %6 : vector<256x128xf32>
    %8 = arith.truncf %7 : vector<256x128xf32> to vector<256x128xbf16>
    %c0_6 = arith.constant 0 : index
    %c0_7 = arith.constant 0 : index
    %9 = vector.load %arg5[%c0_6, %c0_7] : memref<256x128xbf16, #tpu.memory_space<vmem>>, vector<256x128xbf16>
    tpu.vector_store %arg5[%c0_6, %c0_7], %8 {strides = array<i32>} : memref<256x128xbf16, #tpu.memory_space<vmem>>, vector<256x128xbf16>,
    return
  }
  func.func @transform_0(%arg0: i32, %arg1: i32) -> (i32, i32) {
    %c0_i32 = arith.constant 0 : i32
    %c0_i32_0 = arith.constant 0 : i32
    return %arg0, %c0_i32 : i32, i32
  }
  func.func @transform_1(%arg0: i32, %arg1: i32) -> (i32, i32) {
    %c0_i32 = arith.constant 0 : i32
    %c0_i32_0 = arith.constant 0 : i32
    return %c0_i32, %arg1 : i32, i32
  }
  func.func @transform_2(%arg0: i32, %arg1: i32) -> (i32, i32) {
    %c0_i32 = arith.constant 0 : i32
    %c0_i32_0 = arith.constant 0 : i32
    return %c0_i32, %arg1 : i32, i32
  }
  func.func @transform_3(%arg0: i32, %arg1: i32) -> (i32, i32) {
    %c0_i32 = arith.constant 0 : i32
    return %arg0, %arg1 : i32, i32
  }
}

</mosaic_0001>

<bundles_post_ra>
// kernel: _matmul_padded.1
= control target key start
LH: loop header
LB: loop body
LE: loop exit
PB: predicated region body
PF: predicated region fallthrough
CT: control target
= control target key end

     0   :  { %8 = vsyncpa [#allocation3], 0  ;;  %s1783_s0 = inlined_call_operand.hbm [shape: bf16[1024,128], index: 0, kind: input, shape index: {}]   ;;  %s1784_s1 = inlined_call_operand.hbm [shape: bf16[128,128], index: 1, kind: input, shape index: {}]   ;;  %s1785_s2 = inlined_call_operand.vmem [shape: f32[1,128], index: 2, kind: input, shape index: {}]   ;;  %s1786_s3 = inlined_call_operand.hbm [shape: bf16[1024,128], index: 3, kind: output, shape index: {}]  }
   0x1   :  { %10 = vsyncpa [#allocation3 + $0x1], 0 }
   0x2   :  { %11 = vsyncpa [#allocation6], 0 }
   0x3   :  { %12 = vsyncpa [#allocation4], 0 }
   0x4   :  { %14 = vsyncpa [#allocation4 + $0x1], 0  ;;  %s1482_s12 = smov 0   ;;  %s1484_s13 = smov 0  }
   0x5   :  { %s1486_s14 = smov 0   ;;  %s1488_s15 = smov 0  }
   0x6   :  { %s1490_s16 = smov 0   ;;  %s1492_s17 = smov 0  }
   0x7 LB: > { %s916_s18 = sadd.s32 4294967295, %s1453_s17   ;;  %s917_s19 = sadd.s32 4294967294, %s1453_s17   ;;  %s1453_s17 = sphi %s1492_s17, %s20_s17   ;;  %s1449_s16 = sphi %s1490_s16, %s1809_s16   ;;  %s1445_s15 = sphi %s1488_s15, %s1808_s15   ;;  %s1441_s14 = sphi %s1486_s14, %s1807_s14   ;;  %s1437_s13 = sphi %s1484_s13, %s1806_s13   ;;  %s1433_s12 = sphi %s1482_s12, %s1805_s12  }
   0x8   : > { %p52_p0 = scmp.ne.s32.totalorder %s1437_s13, %s1433_s12  ;;  %p1516_p1 = scmp.eq.s32.totalorder %s916_s18, 0 }
   0x9   : > { %p1520_p2 = scmp.eq.s32.totalorder %s916_s18, 3  ;;  %p136_p3 = scmp.eq.s32.totalorder %s917_s19, 3 }
   0xa   : > { %s1791_s20 = scalar_select %p1516_p1, 1, 0 }
   0xb   : > { %s1792_s21 = scalar_select %p1520_p2, 1, 0 }
   0xc   : > { %p1526_p4 = por %p1516_p1, %p52_p0  ;;  %p918_p5 = scmp.ge.s32.totalorder %s1453_s17, 1 }
   0xd   : > { %p1531_p6 = por %p136_p3, %p52_p0  ;;  %p143_p7 = scmp.lt.s32.totalorder %s1453_s17, 5 }
   0xe   : > { %s1793_s22 = scalar_select %p1526_p4, 1, 0 }
   0xf   : > { %s1794_s23 = scalar_select %p1531_p6, 1, 0 }
  0x10   : > { %p1536_p8 = pnand %p918_p5, %p143_p7  ;;  %s1455_s25 = smov [#allocation5]  }
  0x11   : > { %s157_s26 = sshll.u32 %s1455_s25, 4  ;;  %s32_s28 = sadd.s32 1, %s1449_s16  ;;  %s158_s26 = int_to_ptr.vmem [resolvable:$true] %s157_s26 }
  0x12   : > { %s1795_s24 = scalar_select %p1536_p8, 1, 0 }
  0x13   : > { %p1216_p9 = pneg %p1536_p8  ;;  %s1309_s4 = scalar_lea.hbm %s1784_s1, 1024 }
  0x14   : > { %p1310_p11 = scmp.ne.s32.totalorder %s1784_s1, %s1309_s4  ;;  %p1316_p3 = scmp.lt.u32.totalorder %s1309_s4, %s1784_s1 }
  0x15   : > { %p1544_p10 = pnand %p1216_p9, %p1516_p1 }
  0x17   : > { %p1311_p12 = pneg %p1544_p10 }
  0x19   : > { %p1312_p13 = pnand %p1311_p12, %p1310_p11 }
  0x1b   : > { %p1313_p0 = pneg %p1312_p13 }
  0x1d   : > { %p1318_p5 = pnand %p1316_p3, %p1313_p0 }
  0x1f   : > { %1321 = shalt.err (!%p1318_p5)
}
  0x20   : > { %s1322_s9 = scalar_lea.vmem %s158_s26, 1024  ;;  %p1330_p1 = scmp.lt.s32.totalorder %s158_s26, %s158_s26 }
  0x21   : > { %p1323_p7 = scmp.ne.s32.totalorder %s158_s26, %s1322_s9  ;;  %p1331_p4 = scmp.lt.s32.totalorder %s1322_s9, %s1322_s9 }
  0x23   : > { %p1325_p9 = pnand %p1323_p7, %p1311_p12  ;;  %p1332_p8 = por %p1331_p4, %p1330_p1 }
  0x25   : > { %p1326_p6 = pneg %p1325_p9 }
  0x27   : > { %p1333_p2 = pnand %p1332_p8, %p1326_p6 }
  0x29   : > { %1336 = shalt.err (!%p1333_p2)
}
  0x2a   : > { %s1456_s10 = smov 64   ;;  %s1457_s11 = smov 4  }
  0x2b   : > { %1219 = dma.hbm_to_vmem [thread:$0]  (!%p1544_p10), %s1784_s1, 1024, %s158_s26, [#allocation6], %s1456_s10, %s1456_s10, %s1457_s11  }
  0x2c   : > { %p34_p1 = scmp.ge.s32.totalorder %s32_s28, 4  ;;  %s39_s25 = sadd.s32 1, %s1441_s14 }
  0x2d   : > { %p46_p2 = scmp.ne.s32.totalorder %s1441_s14, %s1437_s13  ;;  %p47_p4 = scmp.eq.s32.totalorder %s1453_s17, 0 }
  0x2e   : > { %s1811_s28 = smov (%p34_p1, %s32_s28), 0  ;;  %p1798_p8 = scmp.ne.s32.totalorder %s1792_s21, 0 }
  0x2f   : > { %p1574_p6 = por %p47_p4, %p46_p2  ;;  %s36_s30 = ssub.s32 %s1449_s16, %s1811_s28 }
  0x30   : > { %p1580_p11 = por %p1798_p8, %p46_p2  ;;  %p1229_p12 = scmp.lt.s32.totalorder %s1453_s17, 4 }
  0x31   : > { %p37_p10 = scmp.eq.s32.totalorder %s36_s30, 0  ;;  %s177_s26 = sand.u32 1, %s1441_s14  }
  0x32   : > { %s922_s4 = sshll.u32 %s177_s26, 7  ;;  %s991_s6 = sshll.u32 %s1449_s16, 11 }
  0x33   : > { %s1589_s5 = scalar_select %p37_p10, %s1441_s14, %s39_s25  }
  0x34   : > { %s1595_s9 = scalar_lea.hbm %s1783_s0, %s991_s6  ;;  %s181_s21 = scalar_lea.vmem [#allocation2], %s922_s4 }
  0x35   : > { %s188_s18 = sshll.u32 %s181_s21, 4  ;;  %p1601_p13 = pnand %p1229_p12, %p1574_p6  ;;  %s1597_s18 = int_to_ptr.vmem [resolvable:$true] %s188_s18 }
  0x36   : > { %s1605_s25 = scalar_lea.sflag [#allocation3], %s177_s26  ;;  %s1337_s30 = scalar_lea.hbm %s1595_s9, 2048 }
  0x37   : > { %p1338_p0 = scmp.ne.s32.totalorder %s1595_s9, %s1337_s30  ;;  %p1339_p3 = pneg %p1601_p13 }
  0x38   : > { %s1342_s29 = scalar_lea.hbm %s1783_s0, 8192  ;;  %p1343_p9 = scmp.lt.u32.totalorder %s1595_s9, %s1783_s0 }
  0x39   : > { %p1340_p5 = pnand %p1339_p3, %p1338_p0  ;;  %p1344_p1 = scmp.lt.u32.totalorder %s1342_s29, %s1337_s30 }
  0x3a   : > { %p1346_p4 = scmp.lt.u32.totalorder %s1337_s30, %s1595_s9 }
  0x3b   : > { %p1341_p7 = pneg %p1340_p5  ;;  %p1345_p2 = por %p1344_p1, %p1343_p9 }
  0x3d   : > { %p1347_p6 = por %p1346_p4, %p1345_p2 }
  0x3f   : > { %p1348_p8 = pnand %p1347_p6, %p1341_p7 }
  0x41   : > { %1351 = shalt.err (!%p1348_p8)
}
  0x42   : > { %s1352_s26 = scalar_lea.vmem %s1597_s18, 2048  ;;  %s1458_s21 = smov [#allocation2]  }
  0x43   : > { %p1353_p12 = scmp.ne.s32.totalorder %s1597_s18, %s1352_s26  ;;  %s1357_s4 = sshll.u32 %s1458_s21, 4  ;;  %s1358_s4 = int_to_ptr.vmem [resolvable:$false] %s1357_s4 }
  0x44   : > { %s1359_s6 = scalar_lea.vmem %s1358_s4, 4096  ;;  %p1360_p5 = scmp.lt.s32.totalorder %s1597_s18, %s1358_s4 }
  0x45   : > { %p1355_p10 = pnand %p1353_p12, %p1339_p3  ;;  %p1361_p9 = scmp.lt.s32.totalorder %s1359_s6, %s1352_s26 }
  0x47   : > { %p1356_p0 = pneg %p1355_p10  ;;  %p1362_p1 = por %p1361_p9, %p1360_p5 }
  0x49   : > { %p1363_p2 = pnand %p1362_p1, %p1356_p0 }
  0x4b   : > { %1366 = shalt.err (!%p1363_p2)
}
  0x4c   : > { %1223 = dma.hbm_to_vmem [thread:$0]  (!%p1601_p13), %s1595_s9, 2048, %s1597_s18, %s1605_s25, %s1456_s10, %s1456_s10, %s1457_s11  }
  0x4d   : > { %p1801_p3 = scmp.ne.s32.totalorder %s1795_s24, 0 }
  0x4e   : > { %s1639_s30 = sand.u32 (!%p1801_p3), 1, %s1437_s13   ;;  %p1802_p7 = scmp.ne.s32.totalorder (!%p1801_p3), %s1793_s22, 0 }
  0x4f   : > { %200 = sbr.rel (%p1801_p3) target bundleno = 383 (0x17f), region = 32  ;;  %s926_s29 = sshll.u32 (!%p1801_p3), %s1639_s30, 7 }
  0x50   : > { %s203_s7 = scalar_lea.sflag (!%p1801_p3), [#allocation3], %s1639_s30  ;;  %s1645_s19 = scalar_lea.vmem (!%p1801_p3), [#allocation2], %s926_s29 }
  0x56   : > { %1420 = dma.done.wait (%p1802_p7), %s203_s7, 2048  }
  0x57   : > { %1422 = vsyncadd (%p1802_p7), %s203_s7, 4294965248  ;;  %p1803_p13 = scmp.ne.s32.totalorder %s1791_s20, 0 }
  0x59   : > { %1424 = dma.done.wait (%p1803_p13), [#allocation6], 1024  }
  0x5a   : > { %1426 = vsyncadd (%p1803_p13), [#allocation6], 4294966272  ;;  %v1285_v0 = vld [vmem:[#allocation5] sm:$0xff]   ;;  %v1286_v1 = vld [vmem:[#allocation5 + $0x8] sm:$0xff]   ;;  %s1686_s24 = scalar_lea.vmem [#allocation7], %s926_s29  ;;  %s1024_s10 = sshll.u32 %s1445_s15, 11 }
  0x5b   : > { %1144 = vmatprep.subr.bf16.mxu0 %v1285_v0  ;;  %1192 = vmatprep.subr.bf16.mxu1 %v1285_v0  ;;  %v1287_v2 = vld [vmem:[#allocation5 + $0x10] sm:$0xff]   ;;  %v1288_v3 = vld [vmem:[#allocation5 + $0x18] sm:$0xff]   ;;  %v1293_v4 = vld [vmem:[%s1645_s19] sm:$0xff]   ;;  %s809_s11 = sshll.u32 %s1686_s24, 4  ;;  %s1729_s15 = scalar_lea.hbm %s1786_s3, %s1024_s10  ;;  %s1731_s11 = int_to_ptr.vmem [resolvable:$true] %s809_s11 }
  0x5c   : > { %1145 = vmatpush3.bf16.msra.mxu0 %v1285_v0  ;;  %1200 = vmatpush3.bf16.msra.mxu1 %v1285_v0  ;;  %v1294_v5 = vld [vmem:[%s1645_s19 + $0x40] sm:$0xff]   ;;  %v1290_v7 = vld [vmem:[#allocation5 + $0x28] sm:$0xff]   ;;  %v1291_v8 = vld [vmem:[#allocation5 + $0x30] sm:$0xff]   ;;  %s795_s25 = scalar_lea.sflag [#allocation4], %s1639_s30  ;;  %s1367_s8 = scalar_lea.vmem %s1731_s11, 2048 }
  0x5d   : > { %1146 = vmatprep.subr.bf16.mxu0 %v1286_v1  ;;  %1193 = vmatprep.subr.bf16.mxu1 %v1286_v1  ;;  %v1289_v6 = vld [vmem:[#allocation5 + $0x20] sm:$0xff]   ;;  %v1292_v9 = vld [vmem:[#allocation5 + $0x38] sm:$0xff]   ;;  %v1295_v10 = vld [vmem:[%s1645_s19 + $0x8] sm:$0xff]   ;;  %p1368_p4 = scmp.ne.s32.totalorder %s1731_s11, %s1367_s8  ;;  %s1459_s26 = smov [#allocation7]  }
  0x5e   : > { %1160 = vmatprep.mubr.bf16.mxu0 %v1293_v4  ;;  %1176 = vmatprep.mubr.bf16.mxu1 %v1294_v5  ;;  %v1296_v11 = vld [vmem:[%s1645_s19 + $0x48] sm:$0xff]   ;;  %v1297_v12 = vld [vmem:[%s1645_s19 + $0x10] sm:$0xff]   ;;  %v1299_v14 = vld [vmem:[%s1645_s19 + $0x18] sm:$0xff]   ;;  %s1371_s21 = sshll.u32 %s1459_s26, 4  ;;  %s1372_s21 = int_to_ptr.vmem [resolvable:$false] %s1371_s21 }
  0x5f   : > { %v1298_v13 = vld [vmem:[%s1645_s19 + $0x50] sm:$0xff]   ;;  %v1300_v15 = vld [vmem:[%s1645_s19 + $0x58] sm:$0xff]   ;;  %v1301_v16 = vld [vmem:[%s1645_s19 + $0x20] sm:$0xff]   ;;  %p1369_p6 = pnand %p1368_p4, %p1580_p11  ;;  %s1373_s4 = scalar_lea.vmem %s1372_s21, 4096 }
  0x60   : > { %1147 = vmatpush3.bf16.msra.mxu0 %v1286_v1  ;;  %1201 = vmatpush3.bf16.msra.mxu1 %v1286_v1  ;;  %v1302_v17 = vld [vmem:[%s1645_s19 + $0x60] sm:$0xff]   ;;  %v1303_v18 = vld [vmem:[%s1645_s19 + $0x28] sm:$0xff]   ;;  %v1305_v20 = vld [vmem:[%s1645_s19 + $0x30] sm:$0xff]   ;;  %p1374_p12 = scmp.lt.s32.totalorder %s1731_s11, %s1372_s21  ;;  %p1375_p10 = scmp.lt.s32.totalorder %s1373_s4, %s1367_s8 }
  0x61   : > { %1148 = vmatprep.subr.bf16.mxu0 %v1287_v2  ;;  %1194 = vmatprep.subr.bf16.mxu1 %v1287_v2  ;;  %v1304_v19 = vld [vmem:[%s1645_s19 + $0x68] sm:$0xff]   ;;  %v1306_v21 = vld [vmem:[%s1645_s19 + $0x70] sm:$0xff]   ;;  %v1307_v22 = vld [vmem:[%s1645_s19 + $0x38] sm:$0xff]   ;;  %p1370_p8 = pneg %p1369_p6 }
  0x62   : > { %v1308_v23 = vld [vmem:[%s1645_s19 + $0x78] sm:$0xff]   ;;  %v1674_v24 = vld [vmem:[%s1785_s2] ss:$0 sm:$0xff]  ;;  %p1376_p0 = por %p1375_p10, %p1374_p12 }
  0x64   : > { %1149 = vmatpush3.bf16.msra.mxu0 %v1287_v2  ;;  %1202 = vmatpush3.bf16.msra.mxu1 %v1287_v2  ;;  %p1377_p5 = pnand %p1376_p0, %p1370_p8 }
  0x65   : > { %1150 = vmatprep.subr.bf16.mxu0 %v1288_v3  ;;  %1195 = vmatprep.subr.bf16.mxu1 %v1288_v3 }
  0x68   : > { %1151 = vmatpush3.bf16.msra.mxu0 %v1288_v3  ;;  %1203 = vmatpush3.bf16.msra.mxu1 %v1288_v3 }
  0x69   : > { %1152 = vmatprep.subr.bf16.mxu0 %v1289_v6  ;;  %1196 = vmatprep.subr.bf16.mxu1 %v1289_v6 }
  0x6c   : > { %1153 = vmatpush3.bf16.msra.mxu0 %v1289_v6  ;;  %1204 = vmatpush3.bf16.msra.mxu1 %v1289_v6 }
  0x6d   : > { %1154 = vmatprep.subr.bf16.mxu0 %v1290_v7  ;;  %1197 = vmatprep.subr.bf16.mxu1 %v1290_v7 }
  0x70   : > { %1155 = vmatpush3.bf16.msra.mxu0 %v1290_v7  ;;  %1205 = vmatpush3.bf16.msra.mxu1 %v1290_v7 }
  0x71   : > { %1156 = vmatprep.subr.bf16.mxu0 %v1291_v8  ;;  %1198 = vmatprep.subr.bf16.mxu1 %v1291_v8 }
  0x74   : > { %1157 = vmatpush3.bf16.msra.mxu0 %v1291_v8  ;;  %1206 = vmatpush3.bf16.msra.mxu1 %v1291_v8 }
  0x75   : > { %1158 = vmatprep.subr.bf16.mxu0 %v1292_v9  ;;  %1199 = vmatprep.subr.bf16.mxu1 %v1292_v9 }
  0x78   : > { %1159 = vmatpush3.bf16.msra.mxu0 %v1292_v9  ;;  %1207 = vmatpush3.bf16.msra.mxu1 %v1292_v9 }
  0x7b   : > { %1161 = vmatmul.mubr.bf16.vlgmr.msra.gmra.mrb[0].mxu0 %v1295_v10  ;;  %1177 = vmatmul.mubr.bf16.vlgmr.msra.gmra.mrb[0].mxu1 %v1296_v11 }
  0x7c   : > { %1164 = vmatprep.mubr.bf16.mxu0 %v1297_v12  ;;  %1180 = vmatprep.mubr.bf16.mxu1 %v1298_v13 }
  0x83   : > { %1165 = vmatmul.mubr.bf16.gmra.mrb[4].mxu0 %v1299_v14  ;;  %1181 = vmatmul.mubr.bf16.gmra.mrb[4].mxu1 %v1300_v15 }
  0x84   : > { %1168 = vmatprep.mubr.bf16.mxu0 %v1301_v16  ;;  %1184 = vmatprep.mubr.bf16.mxu1 %v1302_v17 }
  0x8b   : > { %1169 = vmatmul.mubr.bf16.gmra.mrb[8].mxu0 %v1303_v18  ;;  %1185 = vmatmul.mubr.bf16.gmra.mrb[8].mxu1 %v1304_v19 }
  0x8c   : > { %1172 = vmatprep.mubr.bf16.mxu0 %v1305_v20  ;;  %1188 = vmatprep.mubr.bf16.mxu1 %v1306_v21 }
  0x93   : > { %1173 = vmatmul.mubr.bf16.gmra.mrb[12].mxu0 %v1307_v22  ;;  %1189 = vmatmul.mubr.bf16.gmra.mrb[12].mxu1 %v1308_v23 }
 0x14e   : > { %v1162_v25 = vpop.f32.mrb[0].mxu0  ;;  %v1178_v26 = vpop.f32.mrb[0].mxu1 }
 0x14f   : > { %v484_v27 = vadd.f32 %v1162_v25, %v1674_v24  ;;  %v548_v28 = vadd.f32 %v1178_v26, %v1674_v24  ;;  %v475_v29 = vpop.f32.mrb[1].mxu0  ;;  %v539_v30 = vpop.f32.mrb[1].mxu1 }
 0x150   : > { %v476_v31 = vadd.f32 %v1674_v24, %v475_v29  ;;  %v540_v32 = vadd.f32 %v1674_v24, %v539_v30  ;;  %v1163_v33 = vpop.f32.mrb[2].mxu0  ;;  %v1179_v34 = vpop.f32.mrb[2].mxu1 }
 0x151   : > { %v487_v35 = vadd.f32 %v1163_v33, %v1674_v24  ;;  %v551_v36 = vadd.f32 %v1179_v34, %v1674_v24  ;;  %v478_v37 = vpop.f32.mrb[3].mxu0  ;;  %v542_v38 = vpop.f32.mrb[3].mxu1  ;;  %v604_v41 = vmax.f32 %v484_v27, 0.0  ;;  %v620_v42 = vmax.f32 %v548_v28, 0.0 }
 0x152   : > { %v479_v39 = vadd.f32 %v1674_v24, %v478_v37  ;;  %v543_v40 = vadd.f32 %v1674_v24, %v542_v38  ;;  %v602_v45 = vmax.f32 %v476_v31, 0.0  ;;  %v618_v46 = vmax.f32 %v540_v32, 0.0 }
 0x153   : > { %v605_v43 = vmax.f32 %v487_v35, 0.0  ;;  %v621_v44 = vmax.f32 %v551_v36, 0.0 }
 0x154   : > { %v603_v47 = vmax.f32 %v479_v39, 0.0  ;;  %v619_v48 = vmax.f32 %v543_v40, 0.0 }
 0x155   : > { %v1033_v49 = vpack.c.bf16 %v605_v43, %v604_v41  ;;  %v1073_v50 = vpack.c.bf16 %v621_v44, %v620_v42 }
 0x156   : > { %v1028_v51 = vpack.c.bf16 %v603_v47, %v602_v45  ;;  %v1068_v52 = vpack.c.bf16 %v619_v48, %v618_v46  ;;  %v1166_v53 = vpop.f32.mrb[4].mxu0  ;;  %v1182_v54 = vpop.f32.mrb[4].mxu1 }
 0x157   : > { %1105 = vst [vmem:[%s1686_s24 + $0x8] sm:$0xff] %v1033_v49   ;;  %1113 = vst [vmem:[%s1686_s24 + $0x48] sm:$0xff] %v1073_v50   ;;  %v500_v55 = vadd.f32 %v1166_v53, %v1674_v24  ;;  %v564_v56 = vadd.f32 %v1182_v54, %v1674_v24  ;;  %v491_v57 = vpop.f32.mrb[5].mxu0  ;;  %v555_v58 = vpop.f32.mrb[5].mxu1 }
 0x158   : > { %1029 = vst [vmem:[%s1686_s24] sm:$0xff] %v1028_v51   ;;  %1112 = vst [vmem:[%s1686_s24 + $0x40] sm:$0xff] %v1068_v52   ;;  %v492_v59 = vadd.f32 %v1674_v24, %v491_v57  ;;  %v556_v60 = vadd.f32 %v1674_v24, %v555_v58  ;;  %v1167_v61 = vpop.f32.mrb[6].mxu0  ;;  %v1183_v62 = vpop.f32.mrb[6].mxu1 }
 0x159   : > { %v503_v63 = vadd.f32 %v1167_v61, %v1674_v24  ;;  %v567_v0 = vadd.f32 %v1183_v62, %v1674_v24  ;;  %v494_v1 = vpop.f32.mrb[7].mxu0  ;;  %v558_v2 = vpop.f32.mrb[7].mxu1  ;;  %v608_v5 = vmax.f32 %v500_v55, 0.0  ;;  %v624_v6 = vmax.f32 %v564_v56, 0.0 }
 0x15a   : > { %v495_v3 = vadd.f32 %v1674_v24, %v494_v1  ;;  %v559_v4 = vadd.f32 %v1674_v24, %v558_v2  ;;  %v606_v9 = vmax.f32 %v492_v59, 0.0  ;;  %v622_v10 = vmax.f32 %v556_v60, 0.0 }
 0x15b   : > { %v609_v7 = vmax.f32 %v503_v63, 0.0  ;;  %v625_v8 = vmax.f32 %v567_v0, 0.0 }
 0x15c   : > { %v607_v11 = vmax.f32 %v495_v3, 0.0  ;;  %v623_v12 = vmax.f32 %v559_v4, 0.0 }
 0x15d   : > { %v1043_v13 = vpack.c.bf16 %v609_v7, %v608_v5  ;;  %v1083_v14 = vpack.c.bf16 %v625_v8, %v624_v6 }
 0x15e   : > { %v1038_v15 = vpack.c.bf16 %v607_v11, %v606_v9  ;;  %v1078_v16 = vpack.c.bf16 %v623_v12, %v622_v10  ;;  %v1170_v17 = vpop.f32.mrb[8].mxu0  ;;  %v1186_v18 = vpop.f32.mrb[8].mxu1 }
 0x15f   : > { %1107 = vst [vmem:[%s1686_s24 + $0x18] sm:$0xff] %v1043_v13   ;;  %1115 = vst [vmem:[%s1686_s24 + $0x58] sm:$0xff] %v1083_v14   ;;  %v516_v19 = vadd.f32 %v1170_v17, %v1674_v24  ;;  %v580_v20 = vadd.f32 %v1186_v18, %v1674_v24  ;;  %v507_v21 = vpop.f32.mrb[9].mxu0  ;;  %v571_v22 = vpop.f32.mrb[9].mxu1 }
 0x160   : > { %1106 = vst [vmem:[%s1686_s24 + $0x10] sm:$0xff] %v1038_v15   ;;  %1114 = vst [vmem:[%s1686_s24 + $0x50] sm:$0xff] %v1078_v16   ;;  %v508_v23 = vadd.f32 %v1674_v24, %v507_v21  ;;  %v572_v25 = vadd.f32 %v1674_v24, %v571_v22  ;;  %v1171_v26 = vpop.f32.mrb[10].mxu0  ;;  %v1187_v27 = vpop.f32.mrb[10].mxu1 }
 0x161   : > { %v519_v28 = vadd.f32 %v1171_v26, %v1674_v24  ;;  %v583_v29 = vadd.f32 %v1187_v27, %v1674_v24  ;;  %v510_v30 = vpop.f32.mrb[11].mxu0  ;;  %v574_v31 = vpop.f32.mrb[11].mxu1  ;;  %v612_v34 = vmax.f32 %v516_v19, 0.0  ;;  %v628_v35 = vmax.f32 %v580_v20, 0.0 }
 0x162   : > { %v511_v32 = vadd.f32 %v1674_v24, %v510_v30  ;;  %v575_v33 = vadd.f32 %v1674_v24, %v574_v31  ;;  %v610_v38 = vmax.f32 %v508_v23, 0.0  ;;  %v626_v39 = vmax.f32 %v572_v25, 0.0 }
 0x163   : > { %v613_v36 = vmax.f32 %v519_v28, 0.0  ;;  %v629_v37 = vmax.f32 %v583_v29, 0.0 }
 0x164   : > { %v611_v40 = vmax.f32 %v511_v32, 0.0  ;;  %v627_v41 = vmax.f32 %v575_v33, 0.0 }
 0x165   : > { %v1053_v42 = vpack.c.bf16 %v613_v36, %v612_v34  ;;  %v1093_v43 = vpack.c.bf16 %v629_v37, %v628_v35 }
 0x166   : > { %v1048_v44 = vpack.c.bf16 %v611_v40, %v610_v38  ;;  %v1088_v45 = vpack.c.bf16 %v627_v41, %v626_v39  ;;  %v1174_v46 = vpop.f32.mrb[12].mxu0  ;;  %v1190_v47 = vpop.f32.mrb[12].mxu1 }
 0x167   : > { %1109 = vst [vmem:[%s1686_s24 + $0x28] sm:$0xff] %v1053_v42   ;;  %1117 = vst [vmem:[%s1686_s24 + $0x68] sm:$0xff] %v1093_v43   ;;  %v532_v48 = vadd.f32 %v1174_v46, %v1674_v24  ;;  %v596_v49 = vadd.f32 %v1190_v47, %v1674_v24  ;;  %v523_v50 = vpop.f32.mrb[13].mxu0  ;;  %v587_v51 = vpop.f32.mrb[13].mxu1 }
 0x168   : > { %1108 = vst [vmem:[%s1686_s24 + $0x20] sm:$0xff] %v1048_v44   ;;  %1116 = vst [vmem:[%s1686_s24 + $0x60] sm:$0xff] %v1088_v45   ;;  %v524_v52 = vadd.f32 %v1674_v24, %v523_v50  ;;  %v588_v53 = vadd.f32 %v1674_v24, %v587_v51  ;;  %v1175_v54 = vpop.f32.mrb[14].mxu0  ;;  %v1191_v55 = vpop.f32.mrb[14].mxu1 }
 0x169   : > { %v535_v56 = vadd.f32 %v1175_v54, %v1674_v24  ;;  %v599_v57 = vadd.f32 %v1191_v55, %v1674_v24  ;;  %v526_v58 = vpop.f32.mrb[15].mxu0  ;;  %v590_v59 = vpop.f32.mrb[15].mxu1  ;;  %v616_v62 = vmax.f32 %v532_v48, 0.0  ;;  %v632_v63 = vmax.f32 %v596_v49, 0.0 }
 0x16a   : > { %v527_v60 = vadd.f32 %v1674_v24, %v526_v58  ;;  %v591_v61 = vadd.f32 %v1674_v24, %v590_v59  ;;  %v614_v2 = vmax.f32 %v524_v52, 0.0  ;;  %v630_v3 = vmax.f32 %v588_v53, 0.0 }
 0x16b   : > { %v617_v0 = vmax.f32 %v535_v56, 0.0  ;;  %v633_v1 = vmax.f32 %v599_v57, 0.0 }
 0x16c   : > { %v615_v4 = vmax.f32 %v527_v60, 0.0  ;;  %v631_v5 = vmax.f32 %v591_v61, 0.0 }
 0x16d   : > { %v1063_v6 = vpack.c.bf16 %v617_v0, %v616_v62  ;;  %v1103_v7 = vpack.c.bf16 %v633_v1, %v632_v63 }
 0x16e   : > { %v1058_v24 = vpack.c.bf16 %v615_v4, %v614_v2  ;;  %v1098_v8 = vpack.c.bf16 %v631_v5, %v630_v3 }
 0x16f   : > { %1111 = vst [vmem:[%s1686_s24 + $0x38] sm:$0xff] %v1063_v6   ;;  %1119 = vst [vmem:[%s1686_s24 + $0x78] sm:$0xff] %v1103_v7  }
 0x170   : > { %1110 = vst [vmem:[%s1686_s24 + $0x30] sm:$0xff] %v1058_v24   ;;  %1118 = vst [vmem:[%s1686_s24 + $0x70] sm:$0xff] %v1098_v8  }
 0x171   : > { %1380 = shalt.err (!%p1377_p5)
}
 0x172   : > { %s1381_s6 = scalar_lea.hbm %s1729_s15, 2048  ;;  %s1385_s19 = scalar_lea.hbm %s1786_s3, 8192 }
 0x173   : > { %p1382_p9 = scmp.ne.s32.totalorder %s1729_s15, %s1381_s6  ;;  %p1386_p3 = scmp.lt.u32.totalorder %s1729_s15, %s1786_s3 }
 0x174   : > { %p1387_p7 = scmp.lt.u32.totalorder %s1385_s19, %s1381_s6  ;;  %p1389_p4 = scmp.lt.u32.totalorder %s1381_s6, %s1729_s15 }
 0x175   : > { %p1383_p1 = pnand %p1382_p9, %p1580_p11 }
 0x176   : > { %p1388_p13 = por %p1387_p7, %p1386_p3 }
 0x177   : > { %p1384_p2 = pneg %p1383_p1 }
 0x178   : > { %p1390_p6 = por %p1389_p4, %p1388_p13 }
 0x17a   : > { %p1391_p8 = pnand %p1390_p6, %p1384_p2 }
 0x17c   : > { %1394 = shalt.err (!%p1391_p8)
}
 0x17d   : > { %s1460_s24 = smov 64   ;;  %s1461_s10 = smov 4  }
 0x17e   : > { %1214 = dma.vmem_to_hbm [thread:$0]  (%p1580_p11), %s1731_s11, 2048, %s1729_s15, %s795_s25, %s1460_s24, %s1460_s24, %s1461_s10  }
 0x17f PF: > { %p1231_p12 = scmp.ge.s32.totalorder %s1453_s17, 2  ;;  %s824_s9 = sand.u32 1, %s1433_s12  }
 0x180   : > { %p1804_p10 = scmp.ne.s32.totalorder %s1794_s23, 0  ;;  %s825_s18 = scalar_lea.sflag [#allocation4], %s824_s9 }
 0x182   : > { %p1225_p0 = pnand %p1231_p12, %p1804_p10 }
 0x184   : > { %1428 = dma.done.wait (!%p1225_p0), %s825_s18, 2048  }
 0x185   : > { %1430 = vsyncadd (!%p1225_p0), %s825_s18, 4294965248  ;;  %s20_s17 = sadd.s32 1, %s1453_s17   ;;  %s1805_s12 = smov %s1437_s13 }
 0x186   : > { %p17_p5 = scmp.ge.s32.totalorder %s20_s17, 6   ;;  %s1806_s13 = smov %s1441_s14 }
 0x187   : > { %s1807_s14 = smov %s1589_s5  ;;  %s1808_s15 = smov %s1449_s16 }
 0x188   : > { %s1809_s16 = smov %s1811_s28  ;;  %19 = sbr.rel (!%p17_p5) target bundleno = 7 (0x7), region = 85 }
 0x18f   :  { %830 = vsyncpa [#allocation3], 1 }
 0x190   :  { %832 = vsyncpa [#allocation3 + $0x1], 1 }
 0x191   :  { %833 = vsyncpa [#allocation6], 1 }
 0x192   :  { %834 = vsyncpa [#allocation4], 1 }
 0x193   :  { %836 = vsyncpa [#allocation4 + $0x1], 1 }

</bundles_post_ra>
